<compile_context>
chip_gen: v5e
topology: v5e:2x2
jax: 0.10.0
libtpu: 0.0.40
codegen_flags: <defaults>
</compile_context>

<pallas_src>
import functools

import numpy as np
import jax
import jax.numpy as jnp
from jax import lax
from jax.experimental import pallas as pl
from jax.experimental.pallas import tpu as pltpu


# ----------------------------------------------------------------------------
# Helpers
# ----------------------------------------------------------------------------
def _tap_masks(H, W):
    """mask[t, h*W+w] = 1 iff (h + t//3 - 1, w + t%3 - 1) lies inside the HxW image."""
    hh, ww = np.meshgrid(np.arange(H), np.arange(W), indexing="ij")
    rows = []
    for t in range(9):
        dh, dw = t // 3 - 1, t % 3 - 1
        ok = (hh + dh >= 0) & (hh + dh < H) & (ww + dw >= 0) & (ww + dw < W)
        rows.append(ok.reshape(-1))
    return jnp.asarray(np.stack(rows).astype(np.float32))  # (9, H*W)


def _pick_bb(B):
    """Images per grid step: largest divisor of B that still leaves >= 2 grid
    steps (so v7x's two TensorCores both get work), capped at 8."""
    best = 1
    for d in range(1, min(8, max(1, B // 2)) + 1):
        if B % d == 0:
            best = d
    return best


# ----------------------------------------------------------------------------
# Fused kernel: Bb images per grid step, everything in channels-first (C, lanes)
# ----------------------------------------------------------------------------
def _fused_kernel(x_ref, apos_ref, gamma_ref, w3_ref, b3_ref, w4_ref, b4_ref,
                  w5_ref, b5_ref, mask_ref, o_ref, *, W, L):
    Bb, C2, _ = x_ref.shape            # (Bb, in_chs*stride, L) with L == 128 lanes
    C1 = o_ref.shape[1]                # in_chs
    NL = Bb * L                        # lane-stacked batch width

    gamma = gamma_ref[0, 0]            # SMEM scalar
    apos = apos_ref[...]               # (1, L) f32
    mask = mask_ref[...]               # (9, NL) f32 tap masks (tiled per image)

    # ---- channel attention: Bb independent per-image chains (unrolled so the
    #      scheduler can interleave them), DANet style with spatial pos param.
    ys = []
    for b in range(Bb):
        x = x_ref[b]                                            # (C2, L) f32
        xb = x.astype(jnp.bfloat16)                             # cast once, reused
        xpb = (x + apos).astype(jnp.bfloat16)                   # (C2, L)
        # bf16 energy matmul (tiny; see review correctness note on tolerance).
        energy = lax.dot_general(                               # xp @ xp^T -> (C2, C2)
            xpb, xpb, (((1,), (1,)), ((), ())),
            preferred_element_type=jnp.float32)
        # softmax(rowmax(E) - E) == softmax(-E); one row reduction (rowmin).
        p = jnp.exp(jnp.min(energy, axis=-1, keepdims=True) - energy)
        attn = p * pl.reciprocal(jnp.sum(p, axis=-1, keepdims=True), approx=True)
        att = lax.dot_general(                                  # attn @ x -> (C2, L)
            attn.astype(jnp.bfloat16), xb,
            (((1,), (0,)), ((), ())), preferred_element_type=jnp.float32)
        ys.append(gamma * att + x)                              # residual, f32

    # Lane-stack the Bb images: (C2, Bb*L).  Each piece is full-vreg aligned, so
    # this is register placement, not a relayout.
    y = jnp.concatenate(ys, axis=1) if Bb > 1 else ys[0]

    # ---- 1x1 conv on the lane-stacked slab: (C1, C2) @ (C2, NL) + bias
    y = lax.dot_general(w3_ref[...], y.astype(jnp.bfloat16),
                        (((1,), (0,)), ((), ())),
                        preferred_element_type=jnp.float32) + b3_ref[...]

    def conv3x3(z, w_ref_, b_ref_):
        # z: (C1, NL) f32; w_ref_: (C1, 9*C1) bf16; b_ref_: (C1, 1) f32.
        # Each tap = pltpu.roll along lanes (XLU rotate) + border mask; the mask
        # zeroes every wrapped / cross-image / out-of-image lane, so no padded
        # buffer or unaligned slices are needed.  im2col concat stays f32.
        cols = []
        for t in range(9):
            dh, dw = t // 3 - 1, t % 3 - 1
            off = dh * W + dw
            tap = pltpu.roll(z, shift=(-off) % NL, axis=1) if off != 0 else z
            cols.append(tap * mask[t:t + 1, :])
        col = jnp.concatenate(cols, axis=0).astype(jnp.bfloat16)     # (9*C1, NL)
        return lax.dot_general(w_ref_[...], col, (((1,), (0,)), ((), ())),
                               preferred_element_type=jnp.float32) + b_ref_[...]

    y = conv3x3(y, w4_ref, b4_ref)
    y = conv3x3(y, w5_ref, b5_ref)                                   # (C1, NL) f32

    # Full-lane, 128-aligned stores, one per image -- no exit transpose needed.
    for b in range(Bb):
        o_ref[b] = y[:, b * L:(b + 1) * L]


# ----------------------------------------------------------------------------
# Module forward: one tiny XLA view/permute at entry, one fused pallas_call
# ----------------------------------------------------------------------------
def down_pixel_h_pos(x, params, stride=2):
    B, C, H, W = x.shape
    s = stride
    H2, C2, C1 = H // s, C * s, C
    L = H2 * W

    Bb = _pick_bb(B)
    nb = B // Bb
    NL = Bb * L

    # PixelDown along H with positional offset (the view/permute from the module).
    # TODO(synk): at production feature-map sizes, fold this permute + pos-add into
    #             the kernel (cheap sublane swap on the VMEM tile) to avoid the
    #             extra HBM round trip of the activation.
    xr = x.reshape(B, C, H2, s, W).astype(jnp.float32) + params["pos_h"]
    xr = xr.transpose(0, 1, 3, 2, 4).reshape(B, C2, L)

    apos = params["attn_pos"].reshape(1, L).astype(jnp.float32)
    gamma = jnp.asarray(params["gamma"], jnp.float32).reshape(1, 1)
    # Weights as (Cout, ...) matrices; bf16 for the MXU (f32 accumulation in-kernel).
    w3 = params["w3"][:, :, 0, 0].astype(jnp.bfloat16)                          # (C1, C2)
    w4 = jnp.transpose(params["w4"], (0, 2, 3, 1)).reshape(C1, 9 * C1).astype(jnp.bfloat16)
    w5 = jnp.transpose(params["w5"], (0, 2, 3, 1)).reshape(C1, 9 * C1).astype(jnp.bfloat16)
    b3 = params["b3"].reshape(C1, 1).astype(jnp.float32)
    b4 = params["b4"].reshape(C1, 1).astype(jnp.float32)
    b5 = params["b5"].reshape(C1, 1).astype(jnp.float32)
    masks = jnp.tile(_tap_masks(H2, W), (1, Bb))                                # (9, NL)

    rep = lambda i: (0, 0)   # params replicated across the batch grid

    out = pl.pallas_call(
        functools.partial(_fused_kernel, W=W, L=L),
        out_shape=jax.ShapeDtypeStruct((B, C1, L), jnp.float32),
        grid=(nb,),
        in_specs=[
            pl.BlockSpec((Bb, C2, L), lambda i: (i, 0, 0)),     # x (Bb images / step)
            pl.BlockSpec((1, L), rep),                          # attention pos
            pl.BlockSpec(memory_space=pltpu.MemorySpace.SMEM),  # gamma (scalar in SMEM)
            pl.BlockSpec((C1, C2), rep),                        # w3 (1x1)
            pl.BlockSpec((C1, 1), rep),                         # b3
            pl.BlockSpec((C1, 9 * C1), rep),                    # w4 (3x3 im2col)
            pl.BlockSpec((C1, 1), rep),                         # b4
            pl.BlockSpec((C1, 9 * C1), rep),                    # w5 (3x3 im2col)
            pl.BlockSpec((C1, 1), rep),                         # b5
            pl.BlockSpec((9, NL), rep),                         # tap masks (lane-tiled)
        ],
        out_specs=pl.BlockSpec((Bb, C1, L), lambda i: (i, 0, 0)),
        compiler_params=pltpu.CompilerParams(
            dimension_semantics=("parallel",),          # v7x: shard grid across TCs
            vmem_limit_bytes=32 * 1024 * 1024),         # footprint here is <1 MiB;
                                                        # re-derive if shapes scale (v7x: 64 MiB phys)
    )(xr, apos, gamma, w3, b3, w4, b4, w5, b5, masks)

    return out.reshape(B, C1, H2, W)


# ----------------------------------------------------------------------------
# Pure-JAX reference (same math, XLA convs) for a sanity check
# ----------------------------------------------------------------------------
def reference(x, params, stride=2):
    b, c, h, w = x.shape
    s = stride
    out = x.reshape(b, c, h // s, s, w) + params["pos_h"]
    out = out.transpose(0, 1, 3, 2, 4).reshape(b, c * s, h // s, w)
    B, C, H, W = out.shape
    xf = out.reshape(B, C, H * W)
    xp = (out + params["attn_pos"]).reshape(B, C, H * W)
    energy = jnp.einsum("bcp,bkp->bck", xp, xp, precision="highest")
    en = jnp.max(energy, axis=-1, keepdims=True) - energy
    attn = jax.nn.softmax(en, axis=-1)
    o = jnp.einsum("bck,bkp->bcp", attn, xf, precision="highest").reshape(B, C, H, W)
    out = params["gamma"] * o + out

    def conv(y, wgt, bias):
        r = lax.conv_general_dilated(
            y, wgt, (1, 1), "SAME",
            dimension_numbers=("NCHW", "OIHW", "NCHW"),
            precision=lax.Precision.HIGHEST)
        return r + bias.reshape(1, -1, 1, 1)

    out = conv(out, params["w3"], params["b3"])
    out = conv(out, params["w4"], params["b4"])
    out = conv(out, params["w5"], params["b5"])
    return out


def init_params(key, in_chs, stride, feat_height, feat_width):
    ks = jax.random.split(key, 8)
    c2 = in_chs * stride
    fh, fw = feat_height // stride, feat_width
    return {
        # trunc_normal_(std=0.02) approximated by a plain normal * 0.02 (synthetic).
        "pos_h": 0.02 * jax.random.normal(ks[0], (1, 1, 1, stride, 1), jnp.float32),
        "attn_pos": 0.02 * jax.random.normal(ks[1], (1, 1, fh, fw), jnp.float32),
        # gamma is zeros in DANet; use a nonzero value so the attention path is exercised.
        "gamma": jnp.array(0.3, jnp.float32),
        "w3": jax.random.normal(ks[2], (in_chs, c2, 1, 1), jnp.float32) / jnp.sqrt(c2),
        "b3": 0.1 * jax.random.normal(ks[3], (in_chs,), jnp.float32),
        "w4": jax.random.normal(ks[4], (in_chs, in_chs, 3, 3), jnp.float32) / jnp.sqrt(9.0 * in_chs),
        "b4": 0.1 * jax.random.normal(ks[5], (in_chs,), jnp.float32),
        "w5": jax.random.normal(ks[6], (in_chs, in_chs, 3, 3), jnp.float32) / jnp.sqrt(9.0 * in_chs),
        "b5": 0.1 * jax.random.normal(ks[7], (in_chs,), jnp.float32),
    }


if __name__ == "__main__":
    key = jax.random.PRNGKey(0)
    kx, kp = jax.random.split(key)

    B, C, H, W = 4, 8, 16, 16          # x: NCHW, in_chs=8, feat_height=feat_width=16
    stride = 2                         # -> Bb=2 images/step, grid=(2,), L=128 lanes
    x = 0.3 * jax.random.normal(kx, (B, C, H, W), jnp.float32)
    params = init_params(kp, C, stride, H, W)

    fwd = jax.jit(functools.partial(down_pixel_h_pos, stride=stride))
    out = jax.block_until_ready(fwd(x, params))

    assert out.shape == (B, C, H // stride, W), out.shape
    assert bool(jnp.all(jnp.isfinite(out)))

    ref = reference(x, params, stride)
    max_err = float(jnp.max(jnp.abs(out - ref)))
    assert bool(jnp.allclose(out, ref, atol=5e-2, rtol=5e-2)), max_err

    print("KERNEL_OK")
</pallas_src>

<mosaic_0001>
module attributes {stable_mosaic.version = 11 : i64} {
  func.func @_fused_kernel(%arg0: i32, %arg1: memref<2x16x128xf32, #tpu.memory_space<vmem>>, %arg2: memref<1x128xf32, #tpu.memory_space<vmem>>, %arg3: memref<1x1xf32, #tpu.memory_space<smem>>, %arg4: memref<8x16xbf16, #tpu.memory_space<vmem>>, %arg5: memref<8x1xf32, #tpu.memory_space<vmem>>, %arg6: memref<8x72xbf16, #tpu.memory_space<vmem>>, %arg7: memref<8x1xf32, #tpu.memory_space<vmem>>, %arg8: memref<8x72xbf16, #tpu.memory_space<vmem>>, %arg9: memref<8x1xf32, #tpu.memory_space<vmem>>, %arg10: memref<9x256xf32, #tpu.memory_space<vmem>>, %arg11: memref<2x8x128xf32, #tpu.memory_space<vmem>>) attributes {dimension_semantics = [#tpu.dimension_semantics<parallel>], iteration_bounds = array<i64: 2>, scalar_prefetch = 0 : i64, scratch_operands = 0 : i64, tpu.core_type = #tpu.core_type<tc>, window_params = [{transform_indices = @transform_0, window_bounds = array<i64: 2, 16, 128>}, {pipeline_mode = #tpu.pipeline_mode<synchronous>, transform_indices = @transform_1, window_bounds = array<i64: 1, 128>}, {transform_indices = @transform_2, window_bounds = array<i64: 1, 1>}, {pipeline_mode = #tpu.pipeline_mode<synchronous>, transform_indices = @transform_3, window_bounds = array<i64: 8, 16>}, {pipeline_mode = #tpu.pipeline_mode<synchronous>, transform_indices = @transform_4, window_bounds = array<i64: 8, 1>}, {pipeline_mode = #tpu.pipeline_mode<synchronous>, transform_indices = @transform_5, window_bounds = array<i64: 8, 72>}, {pipeline_mode = #tpu.pipeline_mode<synchronous>, transform_indices = @transform_6, window_bounds = array<i64: 8, 1>}, {pipeline_mode = #tpu.pipeline_mode<synchronous>, transform_indices = @transform_7, window_bounds = array<i64: 8, 72>}, {pipeline_mode = #tpu.pipeline_mode<synchronous>, transform_indices = @transform_8, window_bounds = array<i64: 8, 1>}, {pipeline_mode = #tpu.pipeline_mode<synchronous>, transform_indices = @transform_9, window_bounds = array<i64: 9, 256>}, {transform_indices = @transform_10, window_bounds = array<i64: 2, 8, 128>}]} {
    %c0 = arith.constant 0 : index
    %c0_0 = arith.constant 0 : index
    %0 = memref.load %arg3[%c0, %c0_0] : memref<1x1xf32, #tpu.memory_space<smem>>
    %c0_1 = arith.constant 0 : index
    %c0_2 = arith.constant 0 : index
    %1 = vector.load %arg2[%c0_1, %c0_2] : memref<1x128xf32, #tpu.memory_space<vmem>>, vector<1x128xf32>
    %c0_3 = arith.constant 0 : index
    %c0_4 = arith.constant 0 : index
    %2 = vector.load %arg10[%c0_3, %c0_4] : memref<9x256xf32, #tpu.memory_space<vmem>>, vector<9x256xf32>
    %c0_5 = arith.constant 0 : index
    %c0_6 = arith.constant 0 : index
    %c0_7 = arith.constant 0 : index
    %3 = vector.load %arg1[%c0_5, %c0_6, %c0_7] : memref<2x16x128xf32, #tpu.memory_space<vmem>>, vector<1x16x128xf32>
    %4 = vector.shape_cast %3 : vector<1x16x128xf32> to vector<16x128xf32>
    %5 = arith.truncf %4 : vector<16x128xf32> to vector<16x128xbf16>
    %6 = vector.broadcast %1 : vector<1x128xf32> to vector<16x128xf32>
    %7 = arith.addf %4, %6 : vector<16x128xf32>
    %8 = arith.truncf %7 : vector<16x128xf32> to vector<16x128xbf16>
    %cst = arith.constant dense<0.000000e+00> : vector<16x16xf32>
    %9 = tpu.matmul %8, %8, %cst {dimension_numbers = #tpu.dot_dimension_numbers<[1], [1], [0], [0], [0, 0, 1, 0], [], []>} : vector<16x128xbf16>, vector<16x128xbf16>, vector<16x16xf32> -> vector<16x16xf32>
    %cst_8 = arith.constant dense<0x7F800000> : vector<16xf32>
    %10 = vector.multi_reduction <minimumf>, %9, %cst_8 [1] : vector<16x16xf32> to vector<16xf32>
    %11 = vector.shape_cast %10 : vector<16xf32> to vector<16x1xf32>
    %12 = vector.broadcast %11 : vector<16x1xf32> to vector<16x16xf32>
    %13 = arith.subf %12, %9 : vector<16x16xf32>
    %14 = math.exp %13 : vector<16x16xf32>
    %cst_9 = arith.constant dense<0.000000e+00> : vector<16xf32>
    %15 = vector.multi_reduction <add>, %14, %cst_9 [1] : vector<16x16xf32> to vector<16xf32>
    %16 = vector.shape_cast %15 : vector<16xf32> to vector<16x1xf32>
    %17 = tpu.reciprocal %16 {approx = true} : vector<16x1xf32> -> vector<16x1xf32>
    %18 = vector.broadcast %17 : vector<16x1xf32> to vector<16x16xf32>
    %19 = arith.mulf %14, %18 : vector<16x16xf32>
    %20 = arith.truncf %19 : vector<16x16xf32> to vector<16x16xbf16>
    %cst_10 = arith.constant dense<0.000000e+00> : vector<16x128xf32>
    %21 = tpu.matmul %20, %5, %cst_10 {dimension_numbers = #tpu.dot_dimension_numbers<[1], [0], [0], [1], [0, 0, 1, 1], [], []>} : vector<16x16xbf16>, vector<16x128xbf16>, vector<16x128xf32> -> vector<16x128xf32>
    %22 = vector.broadcast %0 : f32 to vector<16x128xf32>
    %23 = arith.mulf %22, %21 : vector<16x128xf32>
    %24 = arith.addf %23, %4 : vector<16x128xf32>
    %c1 = arith.constant 1 : index
    %c0_11 = arith.constant 0 : index
    %c0_12 = arith.constant 0 : index
    %25 = vector.load %arg1[%c1, %c0_11, %c0_12] : memref<2x16x128xf32, #tpu.memory_space<vmem>>, vector<1x16x128xf32>
    %26 = vector.shape_cast %25 : vector<1x16x128xf32> to vector<16x128xf32>
    %27 = arith.truncf %26 : vector<16x128xf32> to vector<16x128xbf16>
    %28 = vector.broadcast %1 : vector<1x128xf32> to vector<16x128xf32>
    %29 = arith.addf %26, %28 : vector<16x128xf32>
    %30 = arith.truncf %29 : vector<16x128xf32> to vector<16x128xbf16>
    %cst_13 = arith.constant dense<0.000000e+00> : vector<16x16xf32>
    %31 = tpu.matmul %30, %30, %cst_13 {dimension_numbers = #tpu.dot_dimension_numbers<[1], [1], [0], [0], [0, 0, 1, 0], [], []>} : vector<16x128xbf16>, vector<16x128xbf16>, vector<16x16xf32> -> vector<16x16xf32>
    %cst_14 = arith.constant dense<0x7F800000> : vector<16xf32>
    %32 = vector.multi_reduction <minimumf>, %31, %cst_14 [1] : vector<16x16xf32> to vector<16xf32>
    %33 = vector.shape_cast %32 : vector<16xf32> to vector<16x1xf32>
    %34 = vector.broadcast %33 : vector<16x1xf32> to vector<16x16xf32>
    %35 = arith.subf %34, %31 : vector<16x16xf32>
    %36 = math.exp %35 : vector<16x16xf32>
    %cst_15 = arith.constant dense<0.000000e+00> : vector<16xf32>
    %37 = vector.multi_reduction <add>, %36, %cst_15 [1] : vector<16x16xf32> to vector<16xf32>
    %38 = vector.shape_cast %37 : vector<16xf32> to vector<16x1xf32>
    %39 = tpu.reciprocal %38 {approx = true} : vector<16x1xf32> -> vector<16x1xf32>
    %40 = vector.broadcast %39 : vector<16x1xf32> to vector<16x16xf32>
    %41 = arith.mulf %36, %40 : vector<16x16xf32>
    %42 = arith.truncf %41 : vector<16x16xf32> to vector<16x16xbf16>
    %cst_16 = arith.constant dense<0.000000e+00> : vector<16x128xf32>
    %43 = tpu.matmul %42, %27, %cst_16 {dimension_numbers = #tpu.dot_dimension_numbers<[1], [0], [0], [1], [0, 0, 1, 1], [], []>} : vector<16x16xbf16>, vector<16x128xbf16>, vector<16x128xf32> -> vector<16x128xf32>
    %44 = vector.broadcast %0 : f32 to vector<16x128xf32>
    %45 = arith.mulf %44, %43 : vector<16x128xf32>
    %46 = arith.addf %45, %26 : vector<16x128xf32>
    %47 = tpu.concatenate %24, %46 in 1 : vector<16x128xf32>, vector<16x128xf32> -> vector<16x256xf32>
    %c0_17 = arith.constant 0 : index
    %c0_18 = arith.constant 0 : index
    %48 = vector.load %arg4[%c0_17, %c0_18] : memref<8x16xbf16, #tpu.memory_space<vmem>>, vector<8x16xbf16>
    %49 = arith.truncf %47 : vector<16x256xf32> to vector<16x256xbf16>
    %cst_19 = arith.constant dense<0.000000e+00> : vector<8x256xf32>
    %50 = tpu.matmul %48, %49, %cst_19 {dimension_numbers = #tpu.dot_dimension_numbers<[1], [0], [0], [1], [0, 0, 1, 1], [], []>} : vector<8x16xbf16>, vector<16x256xbf16>, vector<8x256xf32> -> vector<8x256xf32>
    %c0_20 = arith.constant 0 : index
    %c0_21 = arith.constant 0 : index
    %51 = vector.load %arg5[%c0_20, %c0_21] : memref<8x1xf32, #tpu.memory_space<vmem>>, vector<8x1xf32>
    %52 = vector.broadcast %51 : vector<8x1xf32> to vector<8x256xf32>
    %53 = arith.addf %50, %52 : vector<8x256xf32>
    %c17_i32 = arith.constant 17 : i32
    %54 = tpu.dynamic_rotate %53 by %c17_i32 dim 1 : vector<8x256xf32>, i32 -> vector<8x256xf32>
    %55 = vector.extract_strided_slice %2 {offsets = [0, 0], sizes = [1, 256], strides = [1, 1]} : vector<9x256xf32> to vector<1x256xf32>
    %56 = vector.broadcast %55 : vector<1x256xf32> to vector<8x256xf32>
    %57 = arith.mulf %54, %56 : vector<8x256xf32>
    %c16_i32 = arith.constant 16 : i32
    %58 = tpu.dynamic_rotate %53 by %c16_i32 dim 1 : vector<8x256xf32>, i32 -> vector<8x256xf32>
    %59 = vector.extract_strided_slice %2 {offsets = [1, 0], sizes = [1, 256], strides = [1, 1]} : vector<9x256xf32> to vector<1x256xf32>
    %60 = vector.broadcast %59 : vector<1x256xf32> to vector<8x256xf32>
    %61 = arith.mulf %58, %60 : vector<8x256xf32>
    %c15_i32 = arith.constant 15 : i32
    %62 = tpu.dynamic_rotate %53 by %c15_i32 dim 1 : vector<8x256xf32>, i32 -> vector<8x256xf32>
    %63 = vector.extract_strided_slice %2 {offsets = [2, 0], sizes = [1, 256], strides = [1, 1]} : vector<9x256xf32> to vector<1x256xf32>
    %64 = vector.broadcast %63 : vector<1x256xf32> to vector<8x256xf32>
    %65 = arith.mulf %62, %64 : vector<8x256xf32>
    %c1_i32 = arith.constant 1 : i32
    %66 = tpu.dynamic_rotate %53 by %c1_i32 dim 1 : vector<8x256xf32>, i32 -> vector<8x256xf32>
    %67 = vector.extract_strided_slice %2 {offsets = [3, 0], sizes = [1, 256], strides = [1, 1]} : vector<9x256xf32> to vector<1x256xf32>
    %68 = vector.broadcast %67 : vector<1x256xf32> to vector<8x256xf32>
    %69 = arith.mulf %66, %68 : vector<8x256xf32>
    %70 = vector.extract_strided_slice %2 {offsets = [4, 0], sizes = [1, 256], strides = [1, 1]} : vector<9x256xf32> to vector<1x256xf32>
    %71 = vector.broadcast %70 : vector<1x256xf32> to vector<8x256xf32>
    %72 = arith.mulf %53, %71 : vector<8x256xf32>
    %c255_i32 = arith.constant 255 : i32
    %73 = tpu.dynamic_rotate %53 by %c255_i32 dim 1 : vector<8x256xf32>, i32 -> vector<8x256xf32>
    %74 = vector.extract_strided_slice %2 {offsets = [5, 0], sizes = [1, 256], strides = [1, 1]} : vector<9x256xf32> to vector<1x256xf32>
    %75 = vector.broadcast %74 : vector<1x256xf32> to vector<8x256xf32>
    %76 = arith.mulf %73, %75 : vector<8x256xf32>
    %c241_i32 = arith.constant 241 : i32
    %77 = tpu.dynamic_rotate %53 by %c241_i32 dim 1 : vector<8x256xf32>, i32 -> vector<8x256xf32>
    %78 = vector.extract_strided_slice %2 {offsets = [6, 0], sizes = [1, 256], strides = [1, 1]} : vector<9x256xf32> to vector<1x256xf32>
    %79 = vector.broadcast %78 : vector<1x256xf32> to vector<8x256xf32>
    %80 = arith.mulf %77, %79 : vector<8x256xf32>
    %c240_i32 = arith.constant 240 : i32
    %81 = tpu.dynamic_rotate %53 by %c240_i32 dim 1 : vector<8x256xf32>, i32 -> vector<8x256xf32>
    %82 = vector.extract_strided_slice %2 {offsets = [7, 0], sizes = [1, 256], strides = [1, 1]} : vector<9x256xf32> to vector<1x256xf32>
    %83 = vector.broadcast %82 : vector<1x256xf32> to vector<8x256xf32>
    %84 = arith.mulf %81, %83 : vector<8x256xf32>
    %c239_i32 = arith.constant 239 : i32
    %85 = tpu.dynamic_rotate %53 by %c239_i32 dim 1 : vector<8x256xf32>, i32 -> vector<8x256xf32>
    %86 = vector.extract_strided_slice %2 {offsets = [8, 0], sizes = [1, 256], strides = [1, 1]} : vector<9x256xf32> to vector<1x256xf32>
    %87 = vector.broadcast %86 : vector<1x256xf32> to vector<8x256xf32>
    %88 = arith.mulf %85, %87 : vector<8x256xf32>
    %89 = tpu.concatenate %57, %61, %65, %69, %72, %76, %80, %84, %88 in 0 : vector<8x256xf32>, vector<8x256xf32>, vector<8x256xf32>, vector<8x256xf32>, vector<8x256xf32>, vector<8x256xf32>, vector<8x256xf32>, vector<8x256xf32>, vector<8x256xf32> -> vector<72x256xf32>
    %90 = arith.truncf %89 : vector<72x256xf32> to vector<72x256xbf16>
    %c0_22 = arith.constant 0 : index
    %c0_23 = arith.constant 0 : index
    %91 = vector.load %arg6[%c0_22, %c0_23] : memref<8x72xbf16, #tpu.memory_space<vmem>>, vector<8x72xbf16>
    %cst_24 = arith.constant dense<0.000000e+00> : vector<8x256xf32>
    %92 = tpu.matmul %91, %90, %cst_24 {dimension_numbers = #tpu.dot_dimension_numbers<[1], [0], [0], [1], [0, 0, 1, 1], [], []>} : vector<8x72xbf16>, vector<72x256xbf16>, vector<8x256xf32> -> vector<8x256xf32>
    %c0_25 = arith.constant 0 : index
    %c0_26 = arith.constant 0 : index
    %93 = vector.load %arg7[%c0_25, %c0_26] : memref<8x1xf32, #tpu.memory_space<vmem>>, vector<8x1xf32>
    %94 = vector.broadcast %93 : vector<8x1xf32> to vector<8x256xf32>
    %95 = arith.addf %92, %94 : vector<8x256xf32>
    %c17_i32_27 = arith.constant 17 : i32
    %96 = tpu.dynamic_rotate %95 by %c17_i32_27 dim 1 : vector<8x256xf32>, i32 -> vector<8x256xf32>
    %97 = vector.extract_strided_slice %2 {offsets = [0, 0], sizes = [1, 256], strides = [1, 1]} : vector<9x256xf32> to vector<1x256xf32>
    %98 = vector.broadcast %97 : vector<1x256xf32> to vector<8x256xf32>
    %99 = arith.mulf %96, %98 : vector<8x256xf32>
    %c16_i32_28 = arith.constant 16 : i32
    %100 = tpu.dynamic_rotate %95 by %c16_i32_28 dim 1 : vector<8x256xf32>, i32 -> vector<8x256xf32>
    %101 = vector.extract_strided_slice %2 {offsets = [1, 0], sizes = [1, 256], strides = [1, 1]} : vector<9x256xf32> to vector<1x256xf32>
    %102 = vector.broadcast %101 : vector<1x256xf32> to vector<8x256xf32>
    %103 = arith.mulf %100, %102 : vector<8x256xf32>
    %c15_i32_29 = arith.constant 15 : i32
    %104 = tpu.dynamic_rotate %95 by %c15_i32_29 dim 1 : vector<8x256xf32>, i32 -> vector<8x256xf32>
    %105 = vector.extract_strided_slice %2 {offsets = [2, 0], sizes = [1, 256], strides = [1, 1]} : vector<9x256xf32> to vector<1x256xf32>
    %106 = vector.broadcast %105 : vector<1x256xf32> to vector<8x256xf32>
    %107 = arith.mulf %104, %106 : vector<8x256xf32>
    %c1_i32_30 = arith.constant 1 : i32
    %108 = tpu.dynamic_rotate %95 by %c1_i32_30 dim 1 : vector<8x256xf32>, i32 -> vector<8x256xf32>
    %109 = vector.extract_strided_slice %2 {offsets = [3, 0], sizes = [1, 256], strides = [1, 1]} : vector<9x256xf32> to vector<1x256xf32>
    %110 = vector.broadcast %109 : vector<1x256xf32> to vector<8x256xf32>
    %111 = arith.mulf %108, %110 : vector<8x256xf32>
    %112 = vector.extract_strided_slice %2 {offsets = [4, 0], sizes = [1, 256], strides = [1, 1]} : vector<9x256xf32> to vector<1x256xf32>
    %113 = vector.broadcast %112 : vector<1x256xf32> to vector<8x256xf32>
    %114 = arith.mulf %95, %113 : vector<8x256xf32>
    %c255_i32_31 = arith.constant 255 : i32
    %115 = tpu.dynamic_rotate %95 by %c255_i32_31 dim 1 : vector<8x256xf32>, i32 -> vector<8x256xf32>
    %116 = vector.extract_strided_slice %2 {offsets = [5, 0], sizes = [1, 256], strides = [1, 1]} : vector<9x256xf32> to vector<1x256xf32>
    %117 = vector.broadcast %116 : vector<1x256xf32> to vector<8x256xf32>
    %118 = arith.mulf %115, %117 : vector<8x256xf32>
    %c241_i32_32 = arith.constant 241 : i32
    %119 = tpu.dynamic_rotate %95 by %c241_i32_32 dim 1 : vector<8x256xf32>, i32 -> vector<8x256xf32>
    %120 = vector.extract_strided_slice %2 {offsets = [6, 0], sizes = [1, 256], strides = [1, 1]} : vector<9x256xf32> to vector<1x256xf32>
    %121 = vector.broadcast %120 : vector<1x256xf32> to vector<8x256xf32>
    %122 = arith.mulf %119, %121 : vector<8x256xf32>
    %c240_i32_33 = arith.constant 240 : i32
    %123 = tpu.dynamic_rotate %95 by %c240_i32_33 dim 1 : vector<8x256xf32>, i32 -> vector<8x256xf32>
    %124 = vector.extract_strided_slice %2 {offsets = [7, 0], sizes = [1, 256], strides = [1, 1]} : vector<9x256xf32> to vector<1x256xf32>
    %125 = vector.broadcast %124 : vector<1x256xf32> to vector<8x256xf32>
    %126 = arith.mulf %123, %125 : vector<8x256xf32>
    %c239_i32_34 = arith.constant 239 : i32
    %127 = tpu.dynamic_rotate %95 by %c239_i32_34 dim 1 : vector<8x256xf32>, i32 -> vector<8x256xf32>
    %128 = vector.extract_strided_slice %2 {offsets = [8, 0], sizes = [1, 256], strides = [1, 1]} : vector<9x256xf32> to vector<1x256xf32>
    %129 = vector.broadcast %128 : vector<1x256xf32> to vector<8x256xf32>
    %130 = arith.mulf %127, %129 : vector<8x256xf32>
    %131 = tpu.concatenate %99, %103, %107, %111, %114, %118, %122, %126, %130 in 0 : vector<8x256xf32>, vector<8x256xf32>, vector<8x256xf32>, vector<8x256xf32>, vector<8x256xf32>, vector<8x256xf32>, vector<8x256xf32>, vector<8x256xf32>, vector<8x256xf32> -> vector<72x256xf32>
    %132 = arith.truncf %131 : vector<72x256xf32> to vector<72x256xbf16>
    %c0_35 = arith.constant 0 : index
    %c0_36 = arith.constant 0 : index
    %133 = vector.load %arg8[%c0_35, %c0_36] : memref<8x72xbf16, #tpu.memory_space<vmem>>, vector<8x72xbf16>
    %cst_37 = arith.constant dense<0.000000e+00> : vector<8x256xf32>
    %134 = tpu.matmul %133, %132, %cst_37 {dimension_numbers = #tpu.dot_dimension_numbers<[1], [0], [0], [1], [0, 0, 1, 1], [], []>} : vector<8x72xbf16>, vector<72x256xbf16>, vector<8x256xf32> -> vector<8x256xf32>
    %c0_38 = arith.constant 0 : index
    %c0_39 = arith.constant 0 : index
    %135 = vector.load %arg9[%c0_38, %c0_39] : memref<8x1xf32, #tpu.memory_space<vmem>>, vector<8x1xf32>
    %136 = vector.broadcast %135 : vector<8x1xf32> to vector<8x256xf32>
    %137 = arith.addf %134, %136 : vector<8x256xf32>
    %138 = vector.extract_strided_slice %137 {offsets = [0, 0], sizes = [8, 128], strides = [1, 1]} : vector<8x256xf32> to vector<8x128xf32>
    %c0_40 = arith.constant 0 : index
    %c0_41 = arith.constant 0 : index
    %c0_42 = arith.constant 0 : index
    %139 = vector.load %arg11[%c0_40, %c0_41, %c0_42] : memref<2x8x128xf32, #tpu.memory_space<vmem>>, vector<1x8x128xf32>
    %140 = vector.shape_cast %139 : vector<1x8x128xf32> to vector<8x128xf32>
    %141 = vector.shape_cast %138 : vector<8x128xf32> to vector<1x8x128xf32>
    tpu.vector_store %arg11[%c0_40, %c0_41, %c0_42], %141 {strides = array<i32>} : memref<2x8x128xf32, #tpu.memory_space<vmem>>, vector<1x8x128xf32>,
    %142 = vector.extract_strided_slice %137 {offsets = [0, 128], sizes = [8, 128], strides = [1, 1]} : vector<8x256xf32> to vector<8x128xf32>
    %c1_43 = arith.constant 1 : index
    %c0_44 = arith.constant 0 : index
    %c0_45 = arith.constant 0 : index
    %143 = vector.load %arg11[%c1_43, %c0_44, %c0_45] : memref<2x8x128xf32, #tpu.memory_space<vmem>>, vector<1x8x128xf32>
    %144 = vector.shape_cast %143 : vector<1x8x128xf32> to vector<8x128xf32>
    %145 = vector.shape_cast %142 : vector<8x128xf32> to vector<1x8x128xf32>
    tpu.vector_store %arg11[%c1_43, %c0_44, %c0_45], %145 {strides = array<i32>} : memref<2x8x128xf32, #tpu.memory_space<vmem>>, vector<1x8x128xf32>,
    return
  }
  func.func @transform_0(%arg0: i32) -> (i32, i32, i32) {
    %c0_i32 = arith.constant 0 : i32
    %c0_i32_0 = arith.constant 0 : i32
    %c0_i32_1 = arith.constant 0 : i32
    return %arg0, %c0_i32, %c0_i32_0 : i32, i32, i32
  }
  func.func @transform_1(%arg0: i32) -> (i32, i32) {
    %c0_i32 = arith.constant 0 : i32
    %c0_i32_0 = arith.constant 0 : i32
    %c0_i32_1 = arith.constant 0 : i32
    return %c0_i32, %c0_i32_0 : i32, i32
  }
  func.func @transform_2(%arg0: i32) -> (i32, i32) {
    %c0_i32 = arith.constant 0 : i32
    %c0_i32_0 = arith.constant 0 : i32
    %c0_i32_1 = arith.constant 0 : i32
    return %c0_i32, %c0_i32_0 : i32, i32
  }
  func.func @transform_3(%arg0: i32) -> (i32, i32) {
    %c0_i32 = arith.constant 0 : i32
    %c0_i32_0 = arith.constant 0 : i32
    %c0_i32_1 = arith.constant 0 : i32
    return %c0_i32, %c0_i32_0 : i32, i32
  }
  func.func @transform_4(%arg0: i32) -> (i32, i32) {
    %c0_i32 = arith.constant 0 : i32
    %c0_i32_0 = arith.constant 0 : i32
    %c0_i32_1 = arith.constant 0 : i32
    return %c0_i32, %c0_i32_0 : i32, i32
  }
  func.func @transform_5(%arg0: i32) -> (i32, i32) {
    %c0_i32 = arith.constant 0 : i32
    %c0_i32_0 = arith.constant 0 : i32
    %c0_i32_1 = arith.constant 0 : i32
    return %c0_i32, %c0_i32_0 : i32, i32
  }
  func.func @transform_6(%arg0: i32) -> (i32, i32) {
    %c0_i32 = arith.constant 0 : i32
    %c0_i32_0 = arith.constant 0 : i32
    %c0_i32_1 = arith.constant 0 : i32
    return %c0_i32, %c0_i32_0 : i32, i32
  }
  func.func @transform_7(%arg0: i32) -> (i32, i32) {
    %c0_i32 = arith.constant 0 : i32
    %c0_i32_0 = arith.constant 0 : i32
    %c0_i32_1 = arith.constant 0 : i32
    return %c0_i32, %c0_i32_0 : i32, i32
  }
  func.func @transform_8(%arg0: i32) -> (i32, i32) {
    %c0_i32 = arith.constant 0 : i32
    %c0_i32_0 = arith.constant 0 : i32
    %c0_i32_1 = arith.constant 0 : i32
    return %c0_i32, %c0_i32_0 : i32, i32
  }
  func.func @transform_9(%arg0: i32) -> (i32, i32) {
    %c0_i32 = arith.constant 0 : i32
    %c0_i32_0 = arith.constant 0 : i32
    %c0_i32_1 = arith.constant 0 : i32
    return %c0_i32, %c0_i32_0 : i32, i32
  }
  func.func @transform_10(%arg0: i32) -> (i32, i32, i32) {
    %c0_i32 = arith.constant 0 : i32
    %c0_i32_0 = arith.constant 0 : i32
    %c0_i32_1 = arith.constant 0 : i32
    return %arg0, %c0_i32, %c0_i32_0 : i32, i32, i32
  }
}

</mosaic_0001>

<bundles_post_ra>
// kernel: down_pixel_h_pos.1
= control target key start
LH: loop header
LB: loop body
LE: loop exit
PB: predicated region body
PF: predicated region fallthrough
CT: control target
= control target key end

     0   :  { %s1008_s15 = smov 0   ;;  %s1330_s0 = inlined_call_operand.vmem [shape: f32[4,16,128], index: 0, kind: input, shape index: {}]   ;;  %s1331_s1 = inlined_call_operand.vmem [shape: f32[1,128], index: 1, kind: input, shape index: {}]   ;;  %s1332_s2 = inlined_call_operand.<no memory space> [shape: f32[1,1], index: 2, kind: input, shape index: {}]   ;;  %s1333_s3 = inlined_call_operand.vmem [shape: bf16[8,16], index: 3, kind: input, shape index: {}]   ;;  %s1334_s4 = inlined_call_operand.vmem [shape: f32[8,1], index: 4, kind: input, shape index: {}]   ;;  %s1335_s5 = inlined_call_operand.vmem [shape: bf16[8,72], index: 5, kind: input, shape index: {}]   ;;  %s1336_s6 = inlined_call_operand.vmem [shape: f32[8,1], index: 6, kind: input, shape index: {}]   ;;  %s1337_s7 = inlined_call_operand.vmem [shape: bf16[8,72], index: 7, kind: input, shape index: {}]   ;;  %s1338_s8 = inlined_call_operand.vmem [shape: f32[8,1], index: 8, kind: input, shape index: {}]   ;;  %s1339_s9 = inlined_call_operand.vmem [shape: f32[9,256], index: 9, kind: input, shape index: {}]   ;;  %s1340_s10 = inlined_call_operand.vmem [shape: f32[4,8,128], index: 10, kind: output, shape index: {}]  }
   0x1   :  { %15 = sst [smem:[#allocation2]] %s1332_s2 }
   0x2 LB: > { %s871_s16 = sadd.s32 4294967295, %s939_s15   ;;  %p875_p0 = scmp.ge.s32.totalorder %s939_s15, 1  ;;  %s939_s15 = sphi %s1008_s15, %s21_s15  }
   0x3   : > { %p315_p1 = scmp.lt.s32.totalorder %s939_s15, 3 }
   0x5   : > { %p316_p2 = pnand %p875_p0, %p315_p1 }
   0x6   : > { %s876_s17 = sshll.u32 (!%p316_p2), %s871_s16, 1  ;;  %s368_s23 = sld [smem:[#allocation2]] (!%p316_p2) }
   0x7   : > { %319 = sbr.rel (%p316_p2) target bundleno = 1286 (0x506), region = 60  ;;  %p355_p3 = scmp.lt.s32.totalorder (!%p316_p2), %s876_s17, 3 }
   0x8   : > { %s942_s28 = smov (!%p316_p2), 113   ;;  %s943_s29 = smov (!%p316_p2), 111  }
   0x9   : > { %s944_s30 = smov (!%p316_p2), 15   ;;  %s945_s11 = smov (!%p316_p2), 112  }
   0xa   : > { %s946_s12 = smov (!%p316_p2), 127   ;;  %s947_s13 = smov (!%p316_p2), 1  }
   0xb   : > { %s948_s14 = smov (!%p316_p2), 17   ;;  %s949_s18 = smov (!%p316_p2), 16  }
   0xc   : > { %s1342_s17 = smov (!%p355_p3, %s876_s17), 3  ;;  %v914_v0 = vld [vmem:[%s1331_s1] ss:$0 sm:$0xff]  ;;  %vm397_vm0 = vcmask 130048   ;;  %v941_v57 = vmov 0   ;;  %v438_v58 = vstv %s368_s23  ;;  %vm661_vm2 = vcmask 1043456  }
   0xd   : > { %s894_s19 = sshll.u32 %s1342_s17, 4  ;;  %v511_v55 = vld [vmem:[%s1334_s4] sm:$0xff]  ;;  %912 = vset.pattern.permute.xlu2 %v941_v57  ;;  %913 = vset.pattern.permute.xlu0 %v941_v57  ;;  %vm657_vm10 = vcmask 588800  }
   0xe   : > { %s359_s22 = scalar_lea.vmem %s1330_s0, %s894_s19 }
   0xf   : > { %v1025_v1 = vld [vmem:[%s359_s22] sm:$0xff]  ;;  %v1027_v2 = vld [vmem:[%s359_s22 + $0x8] sm:$0xff]  ;;  %v1029_v3 = vld [vmem:[%s359_s22 + $0x10] sm:$0xff] }
  0x10   : > { %v380_v4 = vadd.f32 %v914_v0, %v1025_v1  ;;  %v381_v5 = vadd.f32 %v914_v0, %v1027_v2  ;;  %v1033_v6 = vld [vmem:[%s359_s22 + $0x18] sm:$0xff]  ;;  %v447_v7 = vadd.f32 %v914_v0, %v1029_v3  ;;  %v376_v39 = vpack.c.bf16 %v1027_v2, %v1025_v1 }
  0x11   : > { %v448_v8 = vadd.f32 %v914_v0, %v1033_v6  ;;  %v446_v40 = vpack.c.bf16 %v1033_v6, %v1029_v3 }
  0x12   : > { %v382_v9 = vpack.c.bf16 %v381_v5, %v380_v4  ;;  %431 = vmatpush.bf16.msra.mxu1 %v376_v39  ;;  %v508_v5 = vld [vmem:[%s1333_s3] sm:$0xf] }
  0x13   : > { %v449_v10 = vpack.c.bf16 %v448_v8, %v447_v7  ;;  %497 = vmatpush.bf16.msra.mxu3 %v446_v40 }
  0x14   : > { %390 = vmatpush.bf16.xpose.msra.mxu0 %v382_v9 }
  0x15   : > { %457 = vmatpush.bf16.xpose.msra.mxu2 %v449_v10 }
  0x1b   : > { %391 = vmatmul.bf16.vlgmr.msra.gmra.mxu0 %v382_v9 }
  0x1c   : > { %458 = vmatmul.bf16.vlgmr.msra.gmra.mxu2 %v449_v10 }
  0x98   : > { %v392_v11 = vpop.f32.mrf.mxu0 }
  0x99   : > { %v398_v12 = vsel %vm397_vm0, %v392_v11, inf }
  0x9a   : > { %399 = vmin.xlane.f32.xlu1 %v398_v12 }
  0x9f   : > { %v459_v13 = vpop.f32.mrf.mxu2 }
  0xa0   : > { %v464_v14 = vsel %vm397_vm0, %v459_v13, inf  ;;  %v394_v15 = vpop.f32.mrf.mxu0 }
  0xa1   : > { %465 = vmin.xlane.f32.xlu0 %v464_v14  ;;  %v401_v16 = vsel %vm397_vm0, %v394_v15, inf }
  0xa2   : > { %402 = vmin.xlane.f32.xlu1 %v401_v16  ;;  %v651_v16 = vld [vmem:[%s1336_s6] sm:$0xff] }
  0xa7   : > { %v461_v17 = vpop.f32.mrf.mxu2 }
  0xa8   : > { %v467_v18 = vsel %vm397_vm0, %v461_v17, inf }
  0xa9   : > { %468 = vmin.xlane.f32.xlu0 %v467_v18 }
 0x10d   : > { %v400_v19 = vpop.xlane.xlu1 %399 }
 0x10e   : > { %v404_v20 = vsub.f32 %v400_v19, %v392_v11 }
 0x110   : > { %v406_v21 = vmul.f32 1.442695, %v404_v20 }
 0x112   : > { %917 = vpow2.f32 %v406_v21  ;;  %v550_v21 = vlaneseq }
 0x114   : > { %v466_v22 = vpop.xlane.xlu0 %465 }
 0x115   : > { %v470_v23 = vsub.f32 %v466_v22, %v459_v13  ;;  %v403_v24 = vpop.xlane.xlu1 %402 }
 0x116   : > { %v405_v25 = vsub.f32 %v403_v24, %v394_v15 }
 0x117   : > { %v472_v26 = vmul.f32 1.442695, %v470_v23  ;;  %v1102_v23 = vand.u32 127, %v550_v21 }
 0x118   : > { %v918_v27 = vpop.eup %917  ;;  %v408_v28 = vmul.f32 1.442695, %v405_v25 }
 0x119   : > { %919 = vpow2.f32 %v472_v26  ;;  %v410_v29 = vsel %vm397_vm0, %v918_v27, 0.0  ;;  %vm633_vm1 = vcmp.lt.s32.totalorder %v1102_v23, 111  ;;  %v1112_v26 = vld [vmem:[%s1339_s9 + $0x10] ss:$0 sm:$0xff]  ;;  %vm611_vm3 = vcmp.lt.s32.totalorder %v1102_v23, 113 }
 0x11a   : > { %921 = vpow2.f32 %v408_v28  ;;  %411 = vadd.xlane.f32.xlu0 %v410_v29  ;;  %vm600_vm4 = vcmp.lt.s32.totalorder %v1102_v23, 127  ;;  %vm622_vm5 = vcmp.lt.s32.totalorder %v1102_v23, 112  ;;  %vm574_vm6 = vcmp.lt.s32.totalorder %v1102_v23, 15 }
 0x11b   : > { %vm585_vm7 = vcmp.lt.s32.totalorder %v1102_v23, 1  ;;  %vm552_vm8 = vcmp.lt.s32.totalorder %v1102_v23, 17  ;;  %vm563_vm9 = vcmp.lt.s32.totalorder %v1102_v23, 16  ;;  %v770_v23 = vld [vmem:[%s1337_s7] sm:$0xf] }
 0x11c   : > { %v469_v30 = vpop.xlane.xlu0 %468 }
 0x11d   : > { %v471_v31 = vsub.f32 %v469_v30, %v461_v17 }
 0x11f   : > { %v920_v32 = vpop.eup %919  ;;  %v474_v33 = vmul.f32 1.442695, %v471_v31 }
 0x120   : > { %v922_v34 = vpop.eup %921  ;;  %v476_v35 = vsel %vm397_vm0, %v920_v32, 0.0 }
 0x121   : > { %923 = vpow2.f32 %v474_v33  ;;  %477 = vadd.xlane.f32.xlu2 %v476_v35  ;;  %v413_v36 = vsel %vm397_vm0, %v922_v34, 0.0  ;;  %v1128_v33 = vld [vmem:[%s1339_s9] sm:$0xff] }
 0x122   : > { %414 = vadd.xlane.f32.xlu1 %v413_v36 }
 0x127   : > { %v924_v37 = vpop.eup %923 }
 0x128   : > { %v479_v38 = vsel %vm397_vm0, %v924_v37, 0.0 }
 0x129   : > { %480 = vadd.xlane.f32.xlu2 %v479_v38 }
 0x141   : > { %514 = vperm.xlu2 %912, %v511_v55  }
 0x18d   : > { %v412_v41 = vpop.xlane.xlu0 %411 }
 0x18e   : > { %925 = vrcp.f32 %v412_v41 }
 0x194   : > { %v478_v42 = vpop.xlane.xlu2 %477  ;;  %v926_v44 = vpop.eup %925 }
 0x195   : > { %v415_v43 = vpop.xlane.xlu1 %414  ;;  %v418_v47 = vmul.f32 %v926_v44, %v918_v27  ;;  %v1117_v27 = vld [vmem:[%s1339_s9 + $0x18] ss:$0 sm:$0xff] }
 0x196   : > { %927 = vrcp.f32 %v415_v43 }
 0x197   : > { %929 = vrcp.f32 %v478_v42  ;;  %v625_v42 = vperm.slane %v1128_v33, 7 }
 0x19c   : > { %v928_v45 = vpop.eup %927  ;;  %v481_v46 = vpop.xlane.xlu2 %480 }
 0x19d   : > { %931 = vrcp.f32 %v481_v46  ;;  %v419_v48 = vmul.f32 %v928_v45, %v922_v34  ;;  %v930_v50 = vpop.eup %929  ;;  %v1133_v34 = vld [vmem:[%s1339_s9 + $0x8] sm:$0xff] }
 0x19e   : > { %v484_v52 = vmul.f32 %v930_v50, %v920_v32  ;;  %v615_v38 = vperm.slane %v1133_v34, 6  ;;  %v626_v43 = vperm.slane %v1133_v34, 7  ;;  %v592_v50 = vperm.slane %v1128_v33, 4 }
 0x19f   : > { %v420_v49 = vpack.c.bf16 %v419_v48, %v418_v47  ;;  %v603_v47 = vperm.slane %v1128_v33, 5  ;;  %v604_v48 = vperm.slane %v1133_v34, 5 }
 0x1a1   : > { %881 = vmatmul.msk.bf16.vlgmr.msra.gmra.mxu1 %vm397_vm0, %v420_v49 }
 0x1a3   : > { %v932_v51 = vpop.eup %931 }
 0x1a4   : > { %v485_v53 = vmul.f32 %v932_v51, %v924_v37  ;;  %v614_v37 = vperm.slane %v1128_v33, 6  ;;  %v593_v51 = vperm.slane %v1133_v34, 4 }
 0x1a6   : > { %v486_v54 = vpack.c.bf16 %v485_v53, %v484_v52 }
 0x1a8   : > { %884 = vmatmul.msk.bf16.vlgmr.msra.gmra.mxu3 %vm397_vm0, %v486_v54 }
 0x21e   : > { %v433_v56 = vpop.f32.mrf.mxu1 }
 0x21f   : > { %v439_v59 = vmul.f32 %v438_v58, %v433_v56 }
 0x221   : > { %v441_v62 = vadd.f32 %v439_v59, %v1025_v1  ;;  %v515_v1 = vpop.permute.xlu2 %514 }
 0x226   : > { %v435_v60 = vpop.f32.mrf.mxu1 }
 0x227   : > { %v440_v61 = vmul.f32 %v438_v58, %v435_v60 }
 0x229   : > { %v442_v63 = vadd.f32 %v440_v61, %v1027_v2 }
 0x22b   : > { %v499_v0 = vpop.f32.mrf.mxu3  ;;  %v509_v4 = vpack.c.bf16 %v442_v63, %v441_v62 }
 0x22c   : > { %v504_v7 = vmul.f32 %v499_v0, %v438_v58  ;;  %v577_v0 = vperm.slane %v1128_v33, 2 }
 0x22d   : > { %527 = vmatpush.bf16.msrb.mxu1 %v509_v4  ;;  %v578_v4 = vperm.slane %v1133_v34, 2 }
 0x22e   : > { %v506_v10 = vadd.f32 %v1029_v3, %v504_v7 }
 0x230   : > { %885 = vmatmul.msk.bf16.vlgmr.msrb.gmra.mxu1 %vm397_vm0, %v508_v5 }
 0x233   : > { %v501_v8 = vpop.f32.mrf.mxu3 }
 0x234   : > { %v505_v9 = vmul.f32 %v501_v8, %v438_v58 }
 0x236   : > { %v507_v11 = vadd.f32 %v1033_v6, %v505_v9 }
 0x238   : > { %v510_v12 = vpack.c.bf16 %v507_v11, %v506_v10  ;;  %v588_v10 = vperm.slane %v1128_v33, 3  ;;  %v589_v11 = vperm.slane %v1133_v34, 3 }
 0x23a   : > { %540 = vmatpush.bf16.msrb.mxu3 %v510_v12 }
 0x23d   : > { %886 = vmatmul.msk.bf16.vlgmr.msrb.gmra.mxu3 %vm397_vm0, %v508_v5 }
 0x2ad   : > { %v529_v2 = vpop.f32.mrf.mxu1 }
 0x2ae   : > { %v1063_v13 = vadd.f32 %v529_v2, %v515_v1 }
 0x2b0   : > { %607 = vrot.lane.b32.xlu2 %v1063_v13, %s942_s28  ;;  %629 = vrot.lane.b32.xlu0 %v1063_v13, %s943_s29  ;;  %v594_v7 = vmul.f32 %v592_v50, %v1063_v13 }
 0x2b1   : > { %570 = vrot.lane.b32.xlu1 %v1063_v13, %s944_s30 }
 0x2b5   : > { %v531_v3 = vpop.f32.mrf.mxu1 }
 0x2b8   : > { %618 = vrot.lane.b32.xlu2 %v1063_v13, %s945_s11  ;;  %596 = vrot.lane.b32.xlu0 %v1063_v13, %s946_s12 }
 0x2c0   : > { %v542_v6 = vpop.f32.mrf.mxu3  ;;  %581 = vrot.lane.b32.xlu2 %v1063_v13, %s947_s13  ;;  %546 = vrot.lane.b32.xlu0 %v1063_v13, %s948_s14 }
 0x2c1   : > { %v1079_v14 = vadd.f32 %v542_v6, %v515_v1 }
 0x2c3   : > { %631 = vrot.lane.b32.xlu1 %v1079_v14, %s943_s29  ;;  %v595_v8 = vmul.f32 %v593_v51, %v1079_v14 }
 0x2c8   : > { %598 = vrot.lane.b32.xlu2 %v1079_v14, %s946_s12  ;;  %609 = vrot.lane.b32.xlu0 %v1079_v14, %s942_s28  ;;  %v544_v15 = vpop.f32.mrf.mxu3 }
 0x2cb   : > { %620 = vrot.lane.b32.xlu1 %v1079_v14, %s945_s11 }
 0x2d0   : > { %548 = vrot.lane.b32.xlu2 %v1079_v14, %s948_s14  ;;  %572 = vrot.lane.b32.xlu0 %v1079_v14, %s944_s30 }
 0x2d3   : > { %583 = vrot.lane.b32.xlu1 %v1079_v14, %s947_s13 }
 0x2d8   : > { %654 = vperm.xlu2 %912, %v651_v16   ;;  %561 = vrot.lane.b32.xlu0 %v1079_v14, %s949_s18 }
 0x2db   : > { %559 = vrot.lane.b32.xlu1 %v1063_v13, %s949_s18 }
 0x30a   : > { %v608_v17 = vpop.permute.xlu2 %607 }
 0x312   : > { %v619_v19 = vpop.permute.xlu2 %618 }
 0x31a   : > { %v1106_v25 = vpop.permute.xlu2 %581 }
 0x322   : > { %v630_v18 = vpop.permute.xlu0 %629  ;;  %v599_v46 = vpop.permute.xlu2 %598 }
 0x323   : > { %v571_v22 = vpop.permute.xlu1 %570 }
 0x32a   : > { %v597_v20 = vpop.permute.xlu0 %596  ;;  %v549_v21 = vpop.permute.xlu2 %548 }
 0x32b   : > { %v601_v52 = vsel %vm600_vm4, %v597_v20, %v599_v46  ;;  %v602_v53 = vsel %vm600_vm4, %v599_v46, %v597_v20  ;;  %v555_v20 = vperm.slane %v1128_v33, 0  ;;  %v650_v46 = vld [vmem:[%s1335_s5] sm:$0xf] }
 0x32c   : > { %v605_v60 = vmul.f32 %v603_v47, %v601_v52  ;;  %v606_v61 = vmul.f32 %v604_v48, %v602_v53 }
 0x32e   : > { %v644_v2 = vpack.c.bf16 %v605_v60, %v594_v7  ;;  %v645_v13 = vpack.c.bf16 %v606_v61, %v595_v8 }
 0x332   : > { %v1104_v24 = vpop.permute.xlu0 %546 }
 0x335   : > { %v632_v28 = vpop.permute.xlu1 %631 }
 0x336   : > { %v634_v29 = vsel %vm633_vm1, %v630_v18, %v632_v28  ;;  %v635_v30 = vsel %vm633_vm1, %v632_v28, %v630_v18  ;;  %v567_v28 = vperm.slane %v1133_v34, 1 }
 0x337   : > { %v638_v31 = vmul.f32 %v1112_v26, %v634_v29  ;;  %v639_v32 = vmul.f32 %v1117_v27, %v635_v30  ;;  %v553_v29 = vsel %vm552_vm8, %v1104_v24, %v549_v21  ;;  %v554_v30 = vsel %vm552_vm8, %v549_v21, %v1104_v24 }
 0x339   : > { %v648_v35 = vpack.c.bf16 %v638_v31, %v638_v31  ;;  %v649_v36 = vpack.c.bf16 %v639_v32, %v639_v32 }
 0x33a   : > { %v610_v39 = vpop.permute.xlu0 %609 }
 0x33b   : > { %v663_v40 = vsel %vm661_vm2, %v648_v35, 0  ;;  %v666_v41 = vsel %vm661_vm2, %v649_v36, 0  ;;  %v612_v44 = vsel %vm611_vm3, %v608_v17, %v610_v39  ;;  %v613_v45 = vsel %vm611_vm3, %v610_v39, %v608_v17 }
 0x33c   : > { %671 = vmatpush.bf16.msrb.mxu0 %v663_v40  ;;  %684 = vmatpush.bf16.msrb.mxu2 %v666_v41  ;;  %v616_v56 = vmul.f32 %v614_v37, %v612_v44  ;;  %v617_v57 = vmul.f32 %v615_v38, %v613_v45  ;;  %v557_v39 = vmul.f32 %v555_v20, %v554_v30 }
 0x33d   : > { %v621_v49 = vpop.permute.xlu1 %620 }
 0x33e   : > { %v623_v54 = vsel %vm622_vm5, %v619_v19, %v621_v49  ;;  %v624_v55 = vsel %vm622_vm5, %v621_v49, %v619_v19  ;;  %v655_v49 = vpop.permute.xlu2 %654 }
 0x33f   : > { %v627_v58 = vmul.f32 %v625_v42, %v623_v54  ;;  %v628_v59 = vmul.f32 %v626_v43, %v624_v55 }
 0x341   : > { %v646_v62 = vpack.c.bf16 %v627_v58, %v616_v56  ;;  %v647_v63 = vpack.c.bf16 %v628_v59, %v617_v57 }
 0x342   : > { %v573_v5 = vpop.permute.xlu0 %572 }
 0x343   : > { %672 = vmatpush.bf16.msrb.mxu0 %v646_v62  ;;  %685 = vmatpush.bf16.msrb.mxu2 %v647_v63  ;;  %v576_v9 = vsel %vm574_vm6, %v573_v5, %v571_v22  ;;  %v575_v12 = vsel %vm574_vm6, %v571_v22, %v573_v5  ;;  %v556_v22 = vperm.slane %v1133_v34, 0 }
 0x344   : > { %v579_v3 = vmul.f32 %v577_v0, %v576_v9  ;;  %v580_v15 = vmul.f32 %v578_v4, %v575_v12 }
 0x345   : > { %v584_v1 = vpop.permute.xlu1 %583  ;;  %v558_v40 = vmul.f32 %v556_v22, %v553_v29 }
 0x346   : > { %v586_v6 = vsel %vm585_vm7, %v1106_v25, %v584_v1  ;;  %v587_v14 = vsel %vm585_vm7, %v584_v1, %v1106_v25  ;;  %v566_v25 = vperm.slane %v1128_v33, 1 }
 0x347   : > { %v590_v16 = vmul.f32 %v588_v10, %v587_v14  ;;  %v591_v17 = vmul.f32 %v589_v11, %v586_v6  ;;  %673 = vmatpush.bf16.msrb.mxu0 %v644_v2  ;;  %686 = vmatpush.bf16.msrb.mxu2 %v645_v13  ;;  %v771_v14 = vld [vmem:[%s1338_s8] sm:$0xff] }
 0x349   : > { %v643_v18 = vpack.c.bf16 %v591_v17, %v580_v15  ;;  %v642_v19 = vpack.c.bf16 %v590_v16, %v579_v3 }
 0x34a   : > { %v562_v31 = vpop.permute.xlu0 %561 }
 0x34b   : > { %687 = vmatpush.bf16.msrb.mxu2 %v643_v18  ;;  %674 = vmatpush.bf16.msrb.mxu0 %v642_v19 }
 0x34d   : > { %v560_v32 = vpop.permute.xlu1 %559 }
 0x34e   : > { %v564_v35 = vsel %vm563_vm9, %v560_v32, %v562_v31  ;;  %v565_v36 = vsel %vm563_vm9, %v562_v31, %v560_v32 }
 0x34f   : > { %v568_v41 = vmul.f32 %v566_v25, %v565_v36  ;;  %v569_v24 = vmul.f32 %v567_v28, %v564_v35 }
 0x351   : > { %v640_v44 = vpack.c.bf16 %v568_v41, %v557_v39  ;;  %v641_v45 = vpack.c.bf16 %v569_v24, %v558_v40 }
 0x353   : > { %675 = vmatpush.bf16.msrb.mxu0 %v640_v44  ;;  %688 = vmatpush.bf16.msrb.mxu2 %v641_v45 }
 0x356   : > { %887 = vmatmul.msk.bf16.vlgmr.msrb.gmra.mxu0 %vm657_vm10, %v650_v46  ;;  %888 = vmatmul.msk.bf16.vlgmr.msrb.gmra.mxu2 %vm657_vm10, %v650_v46 }
 0x3d3   : > { %v677_v52 = vpop.f32.mrf.mxu0 }
 0x3d4   : > { %v678_v53 = vadd.f32 %v677_v52, %v655_v49 }
 0x3d6   : > { %744 = vrot.lane.b32.xlu0 %v678_v53, %s945_s11  ;;  %736 = vrot.lane.b32.xlu2 %v678_v53, %s942_s28 }
 0x3d7   : > { %752 = vrot.lane.b32.xlu1 %v678_v53, %s943_s29 }
 0x3d9   : > { %v690_v54 = vpop.f32.mrf.mxu2 }
 0x3da   : > { %v691_v56 = vadd.f32 %v690_v54, %v655_v49 }
 0x3db   : > { %v679_v55 = vpop.f32.mrf.mxu0 }
 0x3de   : > { %754 = vrot.lane.b32.xlu0 %v691_v56, %s943_s29  ;;  %710 = vrot.lane.b32.xlu2 %v678_v53, %s944_s30 }
 0x3df   : > { %728 = vrot.lane.b32.xlu1 %v678_v53, %s946_s12 }
 0x3e1   : > { %v692_v57 = vpop.f32.mrf.mxu2 }
 0x3e6   : > { %718 = vrot.lane.b32.xlu0 %v678_v53, %s947_s13  ;;  %746 = vrot.lane.b32.xlu2 %v691_v56, %s945_s11 }
 0x3e7   : > { %694 = vrot.lane.b32.xlu1 %v678_v53, %s948_s14 }
 0x3ee   : > { %730 = vrot.lane.b32.xlu0 %v691_v56, %s946_s12  ;;  %720 = vrot.lane.b32.xlu2 %v691_v56, %s947_s13  ;;  %s880_s12 = sshll.u32 %s1342_s17, 3 }
 0x3ef   : > { %738 = vrot.lane.b32.xlu1 %v691_v56, %s942_s28  ;;  %s365_s2 = scalar_lea.vmem %s1340_s10, %s880_s12 }
 0x3f6   : > { %696 = vrot.lane.b32.xlu0 %v691_v56, %s948_s14  ;;  %702 = vrot.lane.b32.xlu2 %v678_v53, %s949_s18 }
 0x3f7   : > { %712 = vrot.lane.b32.xlu1 %v691_v56, %s944_s30 }
 0x3fe   : > { %774 = vperm.xlu0 %913, %v771_v14  }
 0x3ff   : > { %704 = vrot.lane.b32.xlu1 %v691_v56, %s949_s18 }
 0x430   : > { %v737_v58 = vpop.permute.xlu2 %736 }
 0x438   : > { %v711_v7 = vpop.permute.xlu2 %710 }
 0x440   : > { %v747_v15 = vpop.permute.xlu2 %746 }
 0x448   : > { %v745_v59 = vpop.permute.xlu0 %744  ;;  %v721_v24 = vpop.permute.xlu2 %720 }
 0x449   : > { %v753_v60 = vpop.permute.xlu1 %752 }
 0x450   : > { %v755_v61 = vpop.permute.xlu0 %754 }
 0x451   : > { %v756_v62 = vsel %vm633_vm1, %v753_v60, %v755_v61  ;;  %v757_v63 = vsel %vm633_vm1, %v755_v61, %v753_v60  ;;  %v729_v5 = vpop.permute.xlu1 %728 }
 0x452   : > { %v758_v8 = vmul.f32 %v1112_v26, %v756_v62  ;;  %v759_v9 = vmul.f32 %v1117_v27, %v757_v63  ;;  %v748_v26 = vsel %vm622_vm5, %v745_v59, %v747_v15  ;;  %v749_v27 = vsel %vm622_vm5, %v747_v15, %v745_v59 }
 0x453   : > { %v750_v30 = vmul.f32 %v748_v26, %v625_v42  ;;  %v751_v31 = vmul.f32 %v749_v27, %v626_v43 }
 0x454   : > { %v768_v12 = vpack.c.bf16 %v758_v8, %v758_v8  ;;  %v769_v1 = vpack.c.bf16 %v759_v9, %v759_v9 }
 0x456   : > { %v781_v2 = vsel %vm661_vm2, %v768_v12, 0  ;;  %v784_v13 = vsel %vm661_vm2, %v769_v1, 0 }
 0x457   : > { %789 = vmatpush.bf16.msra.mxu1 %v781_v2  ;;  %802 = vmatpush.bf16.msra.mxu3 %v784_v13 }
 0x458   : > { %v719_v3 = vpop.permute.xlu0 %718 }
 0x459   : > { %v695_v6 = vpop.permute.xlu1 %694  ;;  %v723_v42 = vsel %vm585_vm7, %v721_v24, %v719_v3  ;;  %v722_v43 = vsel %vm585_vm7, %v719_v3, %v721_v24 }
 0x45a   : > { %v724_v45 = vmul.f32 %v723_v42, %v588_v10 }
 0x460   : > { %v731_v16 = vpop.permute.xlu0 %730 }
 0x461   : > { %v739_v17 = vpop.permute.xlu1 %738  ;;  %v732_v18 = vsel %vm600_vm4, %v729_v5, %v731_v16  ;;  %v733_v19 = vsel %vm600_vm4, %v731_v16, %v729_v5 }
 0x462   : > { %v740_v21 = vsel %vm611_vm3, %v737_v58, %v739_v17  ;;  %v741_v29 = vsel %vm611_vm3, %v739_v17, %v737_v58  ;;  %v734_v36 = vmul.f32 %v732_v18, %v603_v47  ;;  %v735_v39 = vmul.f32 %v733_v19, %v604_v48 }
 0x463   : > { %v742_v32 = vmul.f32 %v740_v21, %v614_v37  ;;  %v743_v35 = vmul.f32 %v741_v29, %v615_v38  ;;  %v726_v37 = vmul.f32 %v678_v53, %v592_v50  ;;  %v727_v38 = vmul.f32 %v691_v56, %v593_v51 }
 0x464   : > { %v725_v50 = vmul.f32 %v722_v43, %v589_v11  ;;  %v703_v11 = vpop.permute.xlu2 %702 }
 0x465   : > { %v766_v40 = vpack.c.bf16 %v750_v30, %v742_v32  ;;  %v767_v41 = vpack.c.bf16 %v751_v31, %v743_v35  ;;  %v764_v44 = vpack.c.bf16 %v734_v36, %v726_v37  ;;  %v765_v48 = vpack.c.bf16 %v735_v39, %v727_v38 }
 0x467   : > { %790 = vmatpush.bf16.msra.mxu1 %v766_v40  ;;  %803 = vmatpush.bf16.msra.mxu3 %v767_v41 }
 0x468   : > { %v697_v53 = vpop.permute.xlu0 %696 }
 0x469   : > { %v713_v47 = vpop.permute.xlu1 %712  ;;  %v698_v55 = vsel %vm552_vm8, %v695_v6, %v697_v53  ;;  %v699_v56 = vsel %vm552_vm8, %v697_v53, %v695_v6 }
 0x46a   : > { %v714_v46 = vsel %vm574_vm6, %v711_v7, %v713_v47  ;;  %v715_v49 = vsel %vm574_vm6, %v713_v47, %v711_v7  ;;  %v700_v58 = vmul.f32 %v699_v56, %v555_v20  ;;  %v701_v59 = vmul.f32 %v698_v55, %v556_v22 }
 0x46b   : > { %v716_v51 = vmul.f32 %v715_v49, %v577_v0  ;;  %v717_v52 = vmul.f32 %v714_v46, %v578_v4  ;;  %791 = vmatpush.bf16.msra.mxu1 %v764_v44  ;;  %804 = vmatpush.bf16.msra.mxu3 %v765_v48 }
 0x46d   : > { %v762_v54 = vpack.c.bf16 %v724_v45, %v716_v51  ;;  %v763_v10 = vpack.c.bf16 %v725_v50, %v717_v52 }
 0x46f   : > { %792 = vmatpush.bf16.msra.mxu1 %v762_v54  ;;  %805 = vmatpush.bf16.msra.mxu3 %v763_v10 }
 0x470   : > { %v775_v20 = vpop.permute.xlu0 %774 }
 0x471   : > { %v705_v57 = vpop.permute.xlu1 %704 }
 0x472   : > { %v706_v0 = vsel %vm563_vm9, %v703_v11, %v705_v57  ;;  %v707_v4 = vsel %vm563_vm9, %v705_v57, %v703_v11 }
 0x473   : > { %v708_v60 = vmul.f32 %v707_v4, %v566_v25  ;;  %v709_v61 = vmul.f32 %v706_v0, %v567_v28 }
 0x475   : > { %v760_v62 = vpack.c.bf16 %v708_v60, %v700_v58  ;;  %v761_v63 = vpack.c.bf16 %v709_v61, %v701_v59 }
 0x477   : > { %793 = vmatpush.bf16.msra.mxu1 %v760_v62  ;;  %806 = vmatpush.bf16.msra.mxu3 %v761_v63 }
 0x47a   : > { %890 = vmatmul.msk.bf16.vlgmr.msra.gmra.mxu3 %vm657_vm10, %v770_v23  ;;  %889 = vmatmul.msk.bf16.vlgmr.msra.gmra.mxu1 %vm657_vm10, %v770_v23 }
 0x4f7   : > { %v795_v22 = vpop.f32.mrf.mxu1 }
 0x4f8   : > { %v796_v33 = vadd.f32 %v795_v22, %v775_v20 }
 0x4fa   : > { %812 = vst [vmem:[%s365_s2] sm:$0xff] %v796_v33 }
 0x4fd   : > { %v808_v34 = vpop.f32.mrf.mxu3 }
 0x4fe   : > { %v809_v25 = vadd.f32 %v808_v34, %v775_v20 }
 0x4ff   : > { %v797_v28 = vpop.f32.mrf.mxu1 }
 0x500   : > { %891 = vst [vmem:[%s365_s2 + $0x8] sm:$0xff] %v809_v25 }
 0x505   : > { %v810_v5 = vpop.f32.mrf.mxu3 }
 0x506 PF: > { %s21_s15 = sadd.s32 1, %s939_s15  }
 0x507   : > { %p18_p4 = scmp.ge.s32.totalorder %s21_s15, 4  }
 0x509   :  { %20 = sbr.rel (!%p18_p4) target bundleno = 2 (0x2), region = 92 }

</bundles_post_ra>
